<compile_context>
chip_gen: v7x
topology: tpu7x:2x2x1
jax: 0.10.0
libtpu: 0.0.40
codegen_flags: <defaults>
</compile_context>

<pallas_src>
import functools

import jax
import jax.numpy as jnp
from jax.experimental import pallas as pl
from jax.experimental.pallas import tpu as pltpu

LANE = 128


def _round_up(n: int, m: int) -> int:
    return ((n + m - 1) // m) * m


def _default_dot_dtype():
    """bf16 MXU operands on v6e / v7x; f32 elsewhere (e.g. v5e)."""
    try:
        kind = jax.devices()[0].device_kind.lower()
    except Exception:  # pragma: no cover - be conservative
        return jnp.float32
    if any(tag in kind for tag in ("v6", "v7", "trillium")):
        return jnp.bfloat16
    return jnp.float32


def qnet_kernel(x_ref, w1_ref, b1_ref, w2_ref, b2_ref, w3_ref, b3_ref, o_ref):
    # Layer 1: Linear(state_size -> H1) + ReLU.  Kept in f32 (K=8 is nearly free
    # on the MXU) so input precision is never reduced; f32 accumulation.
    h1 = jnp.dot(x_ref[...], w1_ref[...], preferred_element_type=jnp.float32)
    h1 = jnp.maximum(h1 + b1_ref[...], 0.0)            # f32 elementwise (VPU)
    # Layer 2: Linear(H1 -> H2) + ReLU.  Operands in w2's dtype (bf16 on v6e/v7x).
    h2 = jnp.dot(h1.astype(w2_ref.dtype), w2_ref[...],
                 preferred_element_type=jnp.float32)
    h2 = jnp.maximum(h2 + b2_ref[...], 0.0)
    # Layer 3: Linear(H2 -> A), no activation.  Only the real action_size lanes
    # are written back to HBM (masked vst on a (TB, action_size) block).
    out = jnp.dot(h2.astype(w3_ref.dtype), w3_ref[...],
                  preferred_element_type=jnp.float32)
    a = o_ref.shape[-1]
    o_ref[...] = (out[:, :a] + b3_ref[...]).astype(o_ref.dtype)


def prepare_padded_params(params, dot_dtype=None):
    """One-time prep: zero-pad hidden feature dims to 128 lanes and cast layers
    2/3 to the MXU operand dtype.  Call ONCE at init and reuse the result."""
    if dot_dtype is None:
        dot_dtype = _default_dot_dtype()
    w1, b1 = params["w1"], params["b1"]
    w2, b2 = params["w2"], params["b2"]
    w3, b3 = params["w3"], params["b3"]
    s, h1 = w1.shape
    h2, a = w3.shape
    H1, H2, A = _round_up(h1, LANE), _round_up(h2, LANE), _round_up(a, LANE)

    # Layer-1 weights stay f32 (see kernel comment).
    w1p = jnp.zeros((s, H1), jnp.float32).at[:, :h1].set(w1.astype(jnp.float32))
    b1p = jnp.zeros((1, H1), jnp.float32).at[:, :h1].set(
        b1.reshape(1, -1).astype(jnp.float32))
    w2p = jnp.zeros((H1, H2), dot_dtype).at[:h1, :h2].set(w2.astype(dot_dtype))
    b2p = jnp.zeros((1, H2), jnp.float32).at[:, :h2].set(
        b2.reshape(1, -1).astype(jnp.float32))
    w3p = jnp.zeros((H2, A), dot_dtype).at[:h2, :a].set(w3.astype(dot_dtype))
    b3p = b3.reshape(1, -1).astype(jnp.float32)          # unpadded: (1, action_size)
    return (w1p, b1p, w2p, b2p, w3p, b3p)


def _resident(arr):
    # Whole (tiny) array lives in VMEM, same block for every grid step.
    return pl.BlockSpec(arr.shape, lambda i: (0,) * arr.ndim,
                        memory_space=pltpu.VMEM)


@functools.partial(jax.jit, static_argnames=("batch_tile",))
def qnetwork_forward(x, padded_params, *, batch_tile=2048):
    """y = relu(x@W1+b1) -> relu(.@W2+b2) -> .@W3+b3 with weights stored (in,out).

    `padded_params` must come from prepare_padded_params() (done once at init)."""
    w1p, b1p, w2p, b2p, w3p, b3p = padded_params
    B, S = x.shape
    A = b3p.shape[-1]                      # real action_size (b3 is unpadded)
    x = x.astype(jnp.float32)

    # Batch tile: multiple of 8, capped by batch_tile (and 4096 for v5e scoped-VMEM
    # headroom).  For Bp >= 16 aim for >= 2 grid steps so the "parallel" axis can
    # shard across the two v7x TensorCores (negligible cost on v5e/v6e).
    Bp8 = _round_up(B, 8)
    tb = _round_up(pl.cdiv(Bp8, 2), 8) if Bp8 >= 16 else Bp8
    TB = max(8, min(batch_tile, tb, 4096))
    Bp = _round_up(B, TB)
    if Bp != B:
        x = jnp.pad(x, ((0, Bp - B), (0, 0)))

    H1, H2 = w1p.shape[1], w2p.shape[1]
    w_itemsize = jnp.dtype(w2p.dtype).itemsize
    flops = 2 * Bp * (S * H1 + H1 * H2 + H2 * w3p.shape[1])
    bytes_accessed = (
        Bp * S * 4                                         # x (f32)
        + w1p.size * 4 + (w2p.size + w3p.size) * w_itemsize  # weights
        + (b1p.size + b2p.size + b3p.size) * 4             # biases (f32)
        + Bp * A * 4                                       # unpadded output (f32)
    )

    out = pl.pallas_call(
        qnet_kernel,
        out_shape=jax.ShapeDtypeStruct((Bp, A), jnp.float32),
        grid=(Bp // TB,),
        in_specs=[
            pl.BlockSpec((TB, S), lambda i: (i, 0), memory_space=pltpu.VMEM),
            _resident(w1p), _resident(b1p),
            _resident(w2p), _resident(b2p),
            _resident(w3p), _resident(b3p),
        ],
        out_specs=pl.BlockSpec((TB, A), lambda i: (i, 0),
                               memory_space=pltpu.VMEM),
        compiler_params=pltpu.CompilerParams(
            dimension_semantics=("parallel",)),
        cost_estimate=pl.CostEstimate(flops=int(flops), transcendentals=0,
                                      bytes_accessed=int(bytes_accessed)),
    )(x, w1p, b1p, w2p, b2p, w3p, b3p)

    return out[:B] if Bp != B else out


def init_params(key, state_size, action_size, hidden_dims=(64, 64)):
    """PyTorch nn.Linear-style init (uniform +-1/sqrt(fan_in)).
    Weights stored pre-transposed as (in, out); biases as (1, out)."""
    dims = [state_size, hidden_dims[0], hidden_dims[1], action_size]
    params = {}
    for i in range(3):
        fan_in, fan_out = dims[i], dims[i + 1]
        key, kw, kb = jax.random.split(key, 3)
        bound = 1.0 / (fan_in ** 0.5)
        params[f"w{i+1}"] = jax.random.uniform(
            kw, (fan_in, fan_out), jnp.float32, -bound, bound)
        params[f"b{i+1}"] = jax.random.uniform(
            kb, (1, fan_out), jnp.float32, -bound, bound)
    return params


def reference_forward(x, params):
    h1 = jnp.maximum(x @ params["w1"] + params["b1"], 0.0)
    h2 = jnp.maximum(h1 @ params["w2"] + params["b2"], 0.0)
    return h2 @ params["w3"] + params["b3"]


if __name__ == "__main__":
    key = jax.random.PRNGKey(0)
    state_size, action_size, batch = 8, 4, 8

    kx, kp, kx2 = jax.random.split(key, 3)
    x = jax.random.normal(kx, (batch, state_size), jnp.float32)
    params = init_params(kp, state_size, action_size)
    ref = reference_forward(x, params)

    # f32 MXU path: bitwise-faithful to the module's fp32 semantics.
    padded_f32 = jax.block_until_ready(
        prepare_padded_params(params, dot_dtype=jnp.float32))
    out = jax.block_until_ready(qnetwork_forward(x, padded_f32))
    assert out.shape == (batch, action_size)
    assert jnp.allclose(out, ref, atol=1e-5, rtol=1e-5)

    # bf16 MXU-operand path (v6e/v7x fast path); layer 1 stays f32, f32 accumulation.
    padded_bf16 = jax.block_until_ready(
        prepare_padded_params(params, dot_dtype=jnp.bfloat16))
    out_bf16 = jax.block_until_ready(qnetwork_forward(x, padded_bf16))
    assert out_bf16.shape == (batch, action_size)
    assert jnp.allclose(out_bf16, ref, atol=1e-1, rtol=1e-1)

    # Non-multiple-of-tile batch: exercises batch padding + a >1-step grid.
    x2 = jax.random.normal(kx2, (40, state_size), jnp.float32)
    out2 = jax.block_until_ready(qnetwork_forward(x2, padded_f32))
    assert out2.shape == (40, action_size)
    assert jnp.allclose(out2, reference_forward(x2, params), atol=1e-5, rtol=1e-5)

    print("KERNEL_OK")
</pallas_src>

<mosaic_0001>
module attributes {stable_mosaic.version = 11 : i64} {
  func.func @qnet_kernel(%arg0: i32, %arg1: memref<8x8xf32, #tpu.memory_space<vmem>>, %arg2: memref<8x128xf32, #tpu.memory_space<vmem>>, %arg3: memref<1x128xf32, #tpu.memory_space<vmem>>, %arg4: memref<128x128xf32, #tpu.memory_space<vmem>>, %arg5: memref<1x128xf32, #tpu.memory_space<vmem>>, %arg6: memref<128x128xf32, #tpu.memory_space<vmem>>, %arg7: memref<1x4xf32, #tpu.memory_space<vmem>>, %arg8: memref<8x4xf32, #tpu.memory_space<vmem>>) attributes {dimension_semantics = [#tpu.dimension_semantics<parallel>], iteration_bounds = array<i64: 1>, scalar_prefetch = 0 : i64, scratch_operands = 0 : i64, tpu.core_type = #tpu.core_type<tc>, window_params = [{transform_indices = @transform_0, window_bounds = array<i64: 8, 8>}, {pipeline_mode = #tpu.pipeline_mode<synchronous>, transform_indices = @transform_1, window_bounds = array<i64: 8, 128>}, {pipeline_mode = #tpu.pipeline_mode<synchronous>, transform_indices = @transform_2, window_bounds = array<i64: 1, 128>}, {pipeline_mode = #tpu.pipeline_mode<synchronous>, transform_indices = @transform_3, window_bounds = array<i64: 128, 128>}, {pipeline_mode = #tpu.pipeline_mode<synchronous>, transform_indices = @transform_4, window_bounds = array<i64: 1, 128>}, {pipeline_mode = #tpu.pipeline_mode<synchronous>, transform_indices = @transform_5, window_bounds = array<i64: 128, 128>}, {pipeline_mode = #tpu.pipeline_mode<synchronous>, transform_indices = @transform_6, window_bounds = array<i64: 1, 4>}, {transform_indices = @transform_7, window_bounds = array<i64: 8, 4>}]} {
    %c0 = arith.constant 0 : index
    %c0_0 = arith.constant 0 : index
    %0 = vector.load %arg1[%c0, %c0_0] : memref<8x8xf32, #tpu.memory_space<vmem>>, vector<8x8xf32>
    %c0_1 = arith.constant 0 : index
    %c0_2 = arith.constant 0 : index
    %1 = vector.load %arg2[%c0_1, %c0_2] : memref<8x128xf32, #tpu.memory_space<vmem>>, vector<8x128xf32>
    %cst = arith.constant dense<0.000000e+00> : vector<8x128xf32>
    %2 = tpu.matmul %0, %1, %cst {dimension_numbers = #tpu.dot_dimension_numbers<[1], [0], [0], [1], [0, 0, 1, 1], [], []>} : vector<8x8xf32>, vector<8x128xf32>, vector<8x128xf32> -> vector<8x128xf32>
    %c0_3 = arith.constant 0 : index
    %c0_4 = arith.constant 0 : index
    %3 = vector.load %arg3[%c0_3, %c0_4] : memref<1x128xf32, #tpu.memory_space<vmem>>, vector<1x128xf32>
    %4 = vector.broadcast %3 : vector<1x128xf32> to vector<8x128xf32>
    %5 = arith.addf %2, %4 : vector<8x128xf32>
    %cst_5 = arith.constant 0.000000e+00 : f32
    %6 = vector.broadcast %cst_5 : f32 to vector<8x128xf32>
    %7 = arith.maximumf %5, %6 : vector<8x128xf32>
    %c0_6 = arith.constant 0 : index
    %c0_7 = arith.constant 0 : index
    %8 = vector.load %arg4[%c0_6, %c0_7] : memref<128x128xf32, #tpu.memory_space<vmem>>, vector<128x128xf32>
    %cst_8 = arith.constant dense<0.000000e+00> : vector<8x128xf32>
    %9 = tpu.matmul %7, %8, %cst_8 {dimension_numbers = #tpu.dot_dimension_numbers<[1], [0], [0], [1], [0, 0, 1, 1], [], []>} : vector<8x128xf32>, vector<128x128xf32>, vector<8x128xf32> -> vector<8x128xf32>
    %c0_9 = arith.constant 0 : index
    %c0_10 = arith.constant 0 : index
    %10 = vector.load %arg5[%c0_9, %c0_10] : memref<1x128xf32, #tpu.memory_space<vmem>>, vector<1x128xf32>
    %11 = vector.broadcast %10 : vector<1x128xf32> to vector<8x128xf32>
    %12 = arith.addf %9, %11 : vector<8x128xf32>
    %cst_11 = arith.constant 0.000000e+00 : f32
    %13 = vector.broadcast %cst_11 : f32 to vector<8x128xf32>
    %14 = arith.maximumf %12, %13 : vector<8x128xf32>
    %c0_12 = arith.constant 0 : index
    %c0_13 = arith.constant 0 : index
    %15 = vector.load %arg6[%c0_12, %c0_13] : memref<128x128xf32, #tpu.memory_space<vmem>>, vector<128x128xf32>
    %cst_14 = arith.constant dense<0.000000e+00> : vector<8x128xf32>
    %16 = tpu.matmul %14, %15, %cst_14 {dimension_numbers = #tpu.dot_dimension_numbers<[1], [0], [0], [1], [0, 0, 1, 1], [], []>} : vector<8x128xf32>, vector<128x128xf32>, vector<8x128xf32> -> vector<8x128xf32>
    %17 = vector.extract_strided_slice %16 {offsets = [0, 0], sizes = [8, 4], strides = [1, 1]} : vector<8x128xf32> to vector<8x4xf32>
    %c0_15 = arith.constant 0 : index
    %c0_16 = arith.constant 0 : index
    %18 = vector.load %arg7[%c0_15, %c0_16] : memref<1x4xf32, #tpu.memory_space<vmem>>, vector<1x4xf32>
    %19 = vector.broadcast %18 : vector<1x4xf32> to vector<8x4xf32>
    %20 = arith.addf %17, %19 : vector<8x4xf32>
    %c0_17 = arith.constant 0 : index
    %c0_18 = arith.constant 0 : index
    %21 = vector.load %arg8[%c0_17, %c0_18] : memref<8x4xf32, #tpu.memory_space<vmem>>, vector<8x4xf32>
    tpu.vector_store %arg8[%c0_17, %c0_18], %20 {strides = array<i32>} : memref<8x4xf32, #tpu.memory_space<vmem>>, vector<8x4xf32>,
    return
  }
  func.func @transform_0(%arg0: i32) -> (i32, i32) {
    %c0_i32 = arith.constant 0 : i32
    %c0_i32_0 = arith.constant 0 : i32
    return %arg0, %c0_i32 : i32, i32
  }
  func.func @transform_1(%arg0: i32) -> (i32, i32) {
    %c0_i32 = arith.constant 0 : i32
    %c0_i32_0 = arith.constant 0 : i32
    %c0_i32_1 = arith.constant 0 : i32
    return %c0_i32, %c0_i32_0 : i32, i32
  }
  func.func @transform_2(%arg0: i32) -> (i32, i32) {
    %c0_i32 = arith.constant 0 : i32
    %c0_i32_0 = arith.constant 0 : i32
    %c0_i32_1 = arith.constant 0 : i32
    return %c0_i32, %c0_i32_0 : i32, i32
  }
  func.func @transform_3(%arg0: i32) -> (i32, i32) {
    %c0_i32 = arith.constant 0 : i32
    %c0_i32_0 = arith.constant 0 : i32
    %c0_i32_1 = arith.constant 0 : i32
    return %c0_i32, %c0_i32_0 : i32, i32
  }
  func.func @transform_4(%arg0: i32) -> (i32, i32) {
    %c0_i32 = arith.constant 0 : i32
    %c0_i32_0 = arith.constant 0 : i32
    %c0_i32_1 = arith.constant 0 : i32
    return %c0_i32, %c0_i32_0 : i32, i32
  }
  func.func @transform_5(%arg0: i32) -> (i32, i32) {
    %c0_i32 = arith.constant 0 : i32
    %c0_i32_0 = arith.constant 0 : i32
    %c0_i32_1 = arith.constant 0 : i32
    return %c0_i32, %c0_i32_0 : i32, i32
  }
  func.func @transform_6(%arg0: i32) -> (i32, i32) {
    %c0_i32 = arith.constant 0 : i32
    %c0_i32_0 = arith.constant 0 : i32
    %c0_i32_1 = arith.constant 0 : i32
    return %c0_i32, %c0_i32_0 : i32, i32
  }
  func.func @transform_7(%arg0: i32) -> (i32, i32) {
    %c0_i32 = arith.constant 0 : i32
    %c0_i32_0 = arith.constant 0 : i32
    return %arg0, %c0_i32 : i32, i32
  }
}

</mosaic_0001>

<bundles_post_ra>
// kernel: qnetwork_forward.1
= control target key start
LH: loop header
LB: loop body
LE: loop exit
PB: predicated region body
PF: predicated region fallthrough
CT: control target
= control target key end

     0   :  { %12 = vsyncpa [#allocation3], 0  ;;  %s752_s0 = inlined_call_operand.hbm [shape: f32[8,8], index: 0, kind: input, shape index: {}]   ;;  %s753_s1 = inlined_call_operand.hbm [shape: f32[8,128], index: 1, kind: input, shape index: {}]   ;;  %s754_s2 = inlined_call_operand.vmem [shape: f32[1,128], index: 2, kind: input, shape index: {}]   ;;  %s755_s3 = inlined_call_operand.hbm [shape: f32[128,128], index: 3, kind: input, shape index: {}]   ;;  %s756_s4 = inlined_call_operand.vmem [shape: f32[1,128], index: 4, kind: input, shape index: {}]   ;;  %s757_s5 = inlined_call_operand.hbm [shape: f32[128,128], index: 5, kind: input, shape index: {}]   ;;  %s758_s6 = inlined_call_operand.vmem [shape: f32[1,4], index: 6, kind: input, shape index: {}]   ;;  %s759_s7 = inlined_call_operand.vmem [shape: f32[8,4], index: 7, kind: output, shape index: {}]  }
   0x1   :  { %13 = vsyncpa [#allocation5], 0 }
   0x2   :  { %14 = vsyncpa [#allocation8], 0  ;;  %s624_s24 = smov [#allocation4]   ;;  %s625_s26 = smov [#allocation2]  }
   0x3   :  { %s31_s25 = sshll.u32 %s624_s24, 4  ;;  %s21_s27 = sshll.u32 %s625_s26, 4  ;;  %s32_s25 = int_to_ptr.vmem [resolvable:$true] %s31_s25  ;;  %s22_s27 = int_to_ptr.vmem [resolvable:$true] %s21_s27 }
   0x4   :  { %s530_s30 = scalar_lea.hbm %s753_s1, 128 }
   0x5   :  { %p531_p0 = scmp.ne.s32.totalorder %s753_s1, %s530_s30  ;;  %p534_p1 = scmp.lt.u32.totalorder %s530_s30, %s753_s1 }
   0x7   :  { %p536_p2 = pnand %p534_p1, %p531_p0 }
   0x9   :  { %539 = shalt.err (!%p536_p2)
}
   0xa   :  { %s540_s12 = scalar_lea.vmem %s32_s25, 128  ;;  %p545_p4 = scmp.lt.s32.totalorder %s32_s25, %s32_s25 }
   0xb   :  { %p541_p3 = scmp.ne.s32.totalorder %s32_s25, %s540_s12  ;;  %p546_p5 = scmp.lt.s32.totalorder %s540_s12, %s540_s12 }
   0xd   :  { %p547_p6 = por %p546_p5, %p545_p4 }
   0xf   :  { %p548_p7 = pnand %p547_p6, %p541_p3 }
  0x11   :  { %551 = shalt.err (!%p548_p7)
}
  0x12   :  { %34 = dma.hbm_to_vmem [thread:$0]  %s753_s1, 128, %s32_s25, [#allocation5]  }
  0x13   :  { %s552_s17 = scalar_lea.hbm %s752_s0, 128 }
  0x14   :  { %p553_p8 = scmp.ne.s32.totalorder %s752_s0, %s552_s17  ;;  %p556_p9 = scmp.lt.u32.totalorder %s552_s17, %s752_s0 }
  0x16   :  { %p558_p10 = pnand %p556_p9, %p553_p8 }
  0x18   :  { %561 = shalt.err (!%p558_p10)
}
  0x19   :  { %s562_s22 = scalar_lea.vmem %s22_s27, 128  ;;  %p567_p12 = scmp.lt.s32.totalorder %s22_s27, %s22_s27 }
  0x1a   :  { %p563_p11 = scmp.ne.s32.totalorder %s22_s27, %s562_s22  ;;  %p568_p13 = scmp.lt.s32.totalorder %s562_s22, %s562_s22 }
  0x1c   :  { %p569_p0 = por %p568_p13, %p567_p12 }
  0x1e   :  { %p570_p1 = pnand %p569_p0, %p563_p11 }
  0x20   :  { %573 = shalt.err (!%p570_p1)
}
  0x21   :  { %24 = dma.hbm_to_vmem [thread:$0]  %s752_s0, 128, %s22_s27, [#allocation3]  }
  0x22   :  { %s626_s24 = smov [#allocation6]   ;;  %s574_s29 = scalar_lea.hbm %s755_s3, 2048 }
  0x23   :  { %s42_s25 = sshll.u32 %s626_s24, 4  ;;  %p575_p2 = scmp.ne.s32.totalorder %s755_s3, %s574_s29  ;;  %s43_s25 = int_to_ptr.vmem [resolvable:$true] %s42_s25 }
  0x24   :  { %p578_p3 = scmp.lt.u32.totalorder %s574_s29, %s755_s3 }
  0x26   :  { %p580_p4 = pnand %p578_p3, %p575_p2 }
  0x28   :  { %583 = shalt.err (!%p580_p4)
}
  0x29   :  { %s584_s11 = scalar_lea.vmem %s43_s25, 2048  ;;  %p589_p6 = scmp.lt.s32.totalorder %s43_s25, %s43_s25 }
  0x2a   :  { %p585_p5 = scmp.ne.s32.totalorder %s43_s25, %s584_s11  ;;  %p590_p7 = scmp.lt.s32.totalorder %s584_s11, %s584_s11 }
  0x2c   :  { %p591_p8 = por %p590_p7, %p589_p6 }
  0x2e   :  { %p592_p9 = pnand %p591_p8, %p585_p5 }
  0x30   :  { %595 = shalt.err (!%p592_p9)
}
  0x31   :  { %s627_s0 = smov 128   ;;  %s628_s27 = smov 8  }
  0x32   :  { %48 = dma.hbm_to_vmem [thread:$0]  %s755_s3, 2048, %s43_s25, [#allocation5], %s627_s0, %s627_s0, %s628_s27  }
  0x33   :  { %s629_s14 = smov [#allocation7]   ;;  %s596_s18 = scalar_lea.hbm %s757_s5, 2048 }
  0x34   :  { %s56_s15 = sshll.u32 %s629_s14, 4  ;;  %p597_p10 = scmp.ne.s32.totalorder %s757_s5, %s596_s18  ;;  %s57_s15 = int_to_ptr.vmem [resolvable:$true] %s56_s15 }
  0x35   :  { %p600_p11 = scmp.lt.u32.totalorder %s596_s18, %s757_s5 }
  0x37   :  { %p602_p12 = pnand %p600_p11, %p597_p10 }
  0x39   :  { %605 = shalt.err (!%p602_p12)
}
  0x3a   :  { %s606_s1 = scalar_lea.vmem %s57_s15, 2048  ;;  %p611_p0 = scmp.lt.s32.totalorder %s57_s15, %s57_s15 }
  0x3b   :  { %p607_p13 = scmp.ne.s32.totalorder %s57_s15, %s606_s1  ;;  %p612_p1 = scmp.lt.s32.totalorder %s606_s1, %s606_s1 }
  0x3d   :  { %p613_p2 = por %p612_p1, %p611_p0 }
  0x3f   :  { %p614_p3 = pnand %p613_p2, %p607_p13 }
  0x41   :  { %617 = shalt.err (!%p614_p3)
}
  0x42   :  { %62 = dma.hbm_to_vmem [thread:$0]  %s757_s5, 2048, %s57_s15, [#allocation8], %s627_s0, %s627_s0, %s628_s27  }
  0x43   :  { %618 = dma.done.wait [#allocation3], 128  }
  0x44   :  { %619 = vsyncadd [#allocation3], 4294967168 }
  0x45   :  { %620 = dma.done.wait [#allocation5], 2176  }
  0x46   :  { %621 = vsyncadd [#allocation5], 4294965120 }
  0x47   :  { %622 = dma.done.wait [#allocation8], 2048  }
  0x48   :  { %623 = vsyncadd [#allocation8], 4294965248  ;;  %v630_v0 = vmov 0.0   ;;  %vm631_vm0 = vmmov 0   ;;  %v632_v1 = vmov 0.0|0.0   ;;  %vm86_vm1 = vcmask 64512  }
  0x49   :  { %398 = vmatprep.subr.mxu0 %v630_v0  ;;  %400 = vmatprep.mubr.msk.f32.mxu0 %vm631_vm0, %v630_v0  ;;  %v78_v2 = vld [vmem:[#allocation4] sm:$0xff]  ;;  %v77_v3 = vld [vmem:[#allocation2] sm:$0xff]  ;;  %v161_v4 = vld [vmem:[#allocation6] sm:$0xff]  ;;  %vm349_vm2 = vcmask 31744  }
  0x4a   :  { %473 = vmatprep.subr.bf16.mxu1 %v632_v1  ;;  %435 = vmatprep.mubr.msk.f32.mxu1 %vm631_vm0, %v630_v0  ;;  %v162_v5 = vld [vmem:[#allocation6 + $0x8] sm:$0xff]  ;;  %v163_v6 = vld [vmem:[#allocation6 + $0x10] sm:$0xff]  ;;  %v164_v7 = vld [vmem:[#allocation6 + $0x18] sm:$0xff] }
  0x4b   :  { %399 = vmatpush3.msra.mxu0 %v78_v2  ;;  %v474_v8 = vpack.c.bf16 %v162_v5, %v161_v4  ;;  %v477_v9 = vpack.c.bf16 %v164_v7, %v163_v6  ;;  %v165_v10 = vld [vmem:[#allocation6 + $0x20] sm:$0xff]  ;;  %v166_v11 = vld [vmem:[#allocation6 + $0x28] sm:$0xff]  ;;  %v167_v13 = vld [vmem:[#allocation6 + $0x30] sm:$0xff] }
  0x4c   :  { %401 = vmatmul.mubr.msk.f32.vlgmr.msra.gmra.mrb[0].mxu0 %vm86_vm1, %v77_v3  ;;  %497 = vmatprep.subr.bf16.mxu0 %v632_v1  ;;  %v480_v12 = vpack.c.bf16 %v166_v11, %v165_v10  ;;  %v168_v14 = vld [vmem:[#allocation6 + $0x38] sm:$0xff]  ;;  %v169_v16 = vld [vmem:[#allocation6 + $0x40] sm:$0xff]  ;;  %v170_v17 = vld [vmem:[#allocation6 + $0x48] sm:$0xff] }
  0x4d   :  { %470 = vmatprep.mubr.msk.f32.mxu0 %vm631_vm0, %v630_v0  ;;  %475 = vmatpush3.bf16.msra.mxu1 %v474_v8  ;;  %v483_v15 = vpack.c.bf16 %v168_v14, %v167_v13  ;;  %v486_v18 = vpack.c.bf16 %v170_v17, %v169_v16  ;;  %v171_v19 = vld [vmem:[#allocation6 + $0x50] sm:$0xff]  ;;  %v172_v20 = vld [vmem:[#allocation6 + $0x58] sm:$0xff]  ;;  %v173_v22 = vld [vmem:[#allocation6 + $0x60] sm:$0xff] }
  0x4e   :  { %476 = vmatprep.subr.bf16.mxu1 %v632_v1  ;;  %v489_v21 = vpack.c.bf16 %v172_v20, %v171_v19  ;;  %v174_v23 = vld [vmem:[#allocation6 + $0x68] sm:$0xff]  ;;  %v175_v25 = vld [vmem:[#allocation6 + $0x70] sm:$0xff]  ;;  %v176_v26 = vld [vmem:[#allocation6 + $0x78] sm:$0xff] }
  0x4f   :  { %v492_v24 = vpack.c.bf16 %v174_v23, %v173_v22  ;;  %v495_v27 = vpack.c.bf16 %v176_v26, %v175_v25  ;;  %v255_v28 = vld [vmem:[#allocation7] sm:$0xff]  ;;  %v256_v29 = vld [vmem:[#allocation7 + $0x8] sm:$0xff]  ;;  %v257_v30 = vld [vmem:[#allocation7 + $0x10] sm:$0xff] }
  0x50   :  { %v498_v31 = vpack.c.bf16 %v256_v29, %v255_v28  ;;  %v258_v32 = vld [vmem:[#allocation7 + $0x18] sm:$0xff]  ;;  %v259_v34 = vld [vmem:[#allocation7 + $0x20] sm:$0xff]  ;;  %v260_v35 = vld [vmem:[#allocation7 + $0x28] sm:$0xff] }
  0x51   :  { %478 = vmatpush3.bf16.msra.mxu1 %v477_v9  ;;  %v501_v33 = vpack.c.bf16 %v258_v32, %v257_v30  ;;  %v504_v36 = vpack.c.bf16 %v260_v35, %v259_v34  ;;  %v261_v37 = vld [vmem:[#allocation7 + $0x30] sm:$0xff]  ;;  %v262_v38 = vld [vmem:[#allocation7 + $0x38] sm:$0xff]  ;;  %v263_v40 = vld [vmem:[#allocation7 + $0x40] sm:$0xff] }
  0x52   :  { %479 = vmatprep.subr.bf16.mxu1 %v632_v1  ;;  %499 = vmatpush3.bf16.msra.mxu0 %v498_v31  ;;  %v507_v39 = vpack.c.bf16 %v262_v38, %v261_v37  ;;  %v264_v41 = vld [vmem:[#allocation7 + $0x48] sm:$0xff]  ;;  %v265_v43 = vld [vmem:[#allocation7 + $0x50] sm:$0xff]  ;;  %v266_v44 = vld [vmem:[#allocation7 + $0x58] sm:$0xff] }
  0x53   :  { %500 = vmatprep.subr.bf16.mxu0 %v632_v1  ;;  %v510_v42 = vpack.c.bf16 %v264_v41, %v263_v40  ;;  %v513_v45 = vpack.c.bf16 %v266_v44, %v265_v43  ;;  %v267_v46 = vld [vmem:[#allocation7 + $0x60] sm:$0xff]  ;;  %v268_v47 = vld [vmem:[#allocation7 + $0x68] sm:$0xff]  ;;  %v358_v49 = vld [vmem:[%s754_s2] ss:$0 sm:$0xff] }
  0x54   :  { %v516_v48 = vpack.c.bf16 %v268_v47, %v267_v46  ;;  %v269_v54 = vld [vmem:[#allocation7 + $0x70] sm:$0xff]  ;;  %v270_v55 = vld [vmem:[#allocation7 + $0x78] sm:$0xff] }
  0x55   :  { %481 = vmatpush3.bf16.msra.mxu1 %v480_v12  ;;  %v519_v56 = vpack.c.bf16 %v270_v55, %v269_v54  ;;  %v360_v57 = vld [vmem:[%s756_s4] ss:$0 sm:$0xff] }
  0x56   :  { %482 = vmatprep.subr.bf16.mxu1 %v632_v1  ;;  %502 = vmatpush3.bf16.msra.mxu0 %v501_v33  ;;  %v361_v62 = vld [vmem:[%s758_s6] ss:$0 sm:$0xff] }
  0x57   :  { %503 = vmatprep.subr.bf16.mxu0 %v632_v1 }
  0x59   :  { %484 = vmatpush3.bf16.msra.mxu1 %v483_v15 }
  0x5a   :  { %485 = vmatprep.subr.bf16.mxu1 %v632_v1  ;;  %505 = vmatpush3.bf16.msra.mxu0 %v504_v36 }
  0x5b   :  { %506 = vmatprep.subr.bf16.mxu0 %v632_v1 }
  0x5d   :  { %487 = vmatpush3.bf16.msra.mxu1 %v486_v18 }
  0x5e   :  { %488 = vmatprep.subr.bf16.mxu1 %v632_v1  ;;  %508 = vmatpush3.bf16.msra.mxu0 %v507_v39 }
  0x5f   :  { %509 = vmatprep.subr.bf16.mxu0 %v632_v1 }
  0x61   :  { %490 = vmatpush3.bf16.msra.mxu1 %v489_v21 }
  0x62   :  { %491 = vmatprep.subr.bf16.mxu1 %v632_v1  ;;  %511 = vmatpush3.bf16.msra.mxu0 %v510_v42 }
  0x63   :  { %512 = vmatprep.subr.bf16.mxu0 %v632_v1 }
  0x65   :  { %493 = vmatpush3.bf16.msra.mxu1 %v492_v24 }
  0x66   :  { %494 = vmatprep.subr.bf16.mxu1 %v632_v1  ;;  %514 = vmatpush3.bf16.msra.mxu0 %v513_v45 }
  0x67   :  { %515 = vmatprep.subr.bf16.mxu0 %v632_v1 }
  0x69   :  { %496 = vmatpush3.bf16.msra.mxu1 %v495_v27 }
  0x6a   :  { %517 = vmatpush3.bf16.msra.mxu0 %v516_v48 }
  0x6b   :  { %518 = vmatprep.subr.bf16.mxu0 %v632_v1 }
  0x6e   :  { %520 = vmatpush3.bf16.msra.mxu0 %v519_v56 }
 0x11f   :  { %v156_v50 = vpop.f32.mrb[0].mxu0 }
 0x120   :  { %v157_v51 = vadd.f32 %v358_v49, %v156_v50  ;;  %v402_v52 = vpop.f32.mrb[1].mxu0 }
 0x122   :  { %v160_v53 = vmax.f32 %v157_v51, 0.0 }
 0x124   :  { %436 = vmatmul.mubr.f32.vlgmr.msra.gmra.mrb[0].mxu1 %v160_v53 }
 0x1f7   :  { %v250_v58 = vpop.f32.mrb[0].mxu1 }
 0x1f8   :  { %v251_v59 = vadd.f32 %v360_v57, %v250_v58  ;;  %v437_v60 = vpop.f32.mrb[1].mxu1 }
 0x1fa   :  { %v254_v61 = vmax.f32 %v251_v59, 0.0 }
 0x1fc   :  { %471 = vmatmul.mubr.f32.vlgmr.msra.gmra.mrb[2].mxu0 %v254_v61 }
 0x2cf   :  { %v337_v63 = vpop.f32.mrb[2].mxu0 }
 0x2d0   :  { %v348_v0 = vadd.f32 %v361_v62, %v337_v63  ;;  %v472_v1 = vpop.f32.mrb[3].mxu0 }
 0x2d2   :  { %350 = vst.msk [vmem:[%s759_s7] sm:$0xff] %vm349_vm2, %v348_v0 }
 0x2d3   :  { %355 = vsyncpa [#allocation3], 1 }
 0x2d4   :  { %356 = vsyncpa [#allocation5], 1 }
 0x2d5   :  { %357 = vsyncpa [#allocation8], 1 }

</bundles_post_ra>
